<compile_context>
chip_gen: v7x
topology: tpu7x:2x2x1
jax: 0.10.0
libtpu: 0.0.40
codegen_flags: <defaults>
</compile_context>

<pallas_src>
import math

import jax
import jax.numpy as jnp
from jax.experimental import pallas as pl
from jax.experimental.pallas import tpu as pltpu

_TILE_N = 1024  # batch-tile rows for the gridded path (multiple of 8)


def _linear_vpu_kernel(x_ref, wt_ref, b_ref, o_ref):
    """y = x @ W^T + b via VPU broadcast-FMAs (no MXU, no in-kernel transpose).

    x_ref : (tile_n, IN_F)   activation tile
    wt_ref: (IN_F, OUT_F)    weight, already transposed in the wrapper
    b_ref : (1, OUT_F)       bias row
    o_ref : (tile_n, OUT_F)  output tile
    """
    x = x_ref[...]
    wt = wt_ref[...]
    b = b_ref[...]

    in_f = wt.shape[0]  # static (2) -> Python-level unroll at trace time
    acc = b.astype(jnp.float32)  # broadcasts to (tile_n, OUT_F) on first add
    for k in range(in_f):
        # (tile_n, 1) * (1, OUT_F) broadcast multiply on the VPU, f32 accumulate.
        acc = acc + x[:, k:k + 1].astype(jnp.float32) * wt[k:k + 1, :].astype(jnp.float32)
    o_ref[...] = acc.astype(o_ref.dtype)


def logistic_forward(x, weight, bias):
    """Pallas equivalent of Logistic.forward: returns (x @ W^T + b, True)."""
    n, in_f = x.shape
    out_f = weight.shape[0]
    w_t = weight.T              # (IN_F, OUT_F): transpose once, outside the kernel
    bias2d = bias.reshape(1, out_f)

    if n <= _TILE_N:
        # Single block, no grid: avoids the 1-step pipeline prologue/epilogue.
        y = pl.pallas_call(
            _linear_vpu_kernel,
            out_shape=jax.ShapeDtypeStruct((n, out_f), x.dtype),
            in_specs=[
                pl.BlockSpec(memory_space=pltpu.MemorySpace.VMEM),
                pl.BlockSpec(memory_space=pltpu.MemorySpace.VMEM),
                pl.BlockSpec(memory_space=pltpu.MemorySpace.VMEM),
            ],
            out_specs=pl.BlockSpec(memory_space=pltpu.MemorySpace.VMEM),
        )(x, w_t, bias2d)
    else:
        # Batch-tiled, double-buffered, batch axis parallel (megacore on v7x).
        grid = (pl.cdiv(n, _TILE_N),)
        y = pl.pallas_call(
            _linear_vpu_kernel,
            out_shape=jax.ShapeDtypeStruct((n, out_f), x.dtype),
            grid=grid,
            in_specs=[
                pl.BlockSpec((_TILE_N, in_f), lambda i: (i, 0)),
                pl.BlockSpec((in_f, out_f), lambda i: (0, 0)),
                pl.BlockSpec((1, out_f), lambda i: (0, 0)),
            ],
            out_specs=pl.BlockSpec((_TILE_N, out_f), lambda i: (i, 0)),
            compiler_params=pltpu.CompilerParams(
                dimension_semantics=("parallel",)
            ),
        )(x, w_t, bias2d)
    return (y, True)


def init_logistic_params(key, in_features=2, out_features=2, dtype=jnp.float32):
    """Deterministic init matching nn.Linear defaults: U(-1/sqrt(in), 1/sqrt(in))."""
    k_w, k_b = jax.random.split(key)
    bound = 1.0 / math.sqrt(in_features)
    weight = jax.random.uniform(
        k_w, (out_features, in_features), dtype=dtype, minval=-bound, maxval=bound
    )
    bias = jax.random.uniform(
        k_b, (out_features,), dtype=dtype, minval=-bound, maxval=bound
    )
    return weight, bias


if __name__ == "__main__":
    key = jax.random.PRNGKey(0)
    k_x, k_p, k_x2 = jax.random.split(key, 3)

    weight, bias = init_logistic_params(k_p)

    # Small batch -> single-block (no-grid) path.
    x_small = jax.random.normal(k_x, (8, 2), dtype=jnp.float32)
    y_small, flag = logistic_forward(x_small, weight, bias)
    y_small = jax.block_until_ready(y_small)
    assert flag is True
    y_small_ref = x_small @ weight.T + bias
    assert jnp.allclose(y_small, y_small_ref, atol=1e-5, rtol=1e-5), "small-batch mismatch"

    # Larger batch -> batch-tiled, parallel-grid path.
    x_big = jax.random.normal(k_x2, (2048, 2), dtype=jnp.float32)
    y_big, _ = logistic_forward(x_big, weight, bias)
    y_big = jax.block_until_ready(y_big)
    y_big_ref = x_big @ weight.T + bias
    assert jnp.allclose(y_big, y_big_ref, atol=1e-5, rtol=1e-5), "tiled-batch mismatch"

    print("KERNEL_OK")
</pallas_src>

<mosaic_0001>
module attributes {stable_mosaic.version = 11 : i64} {
  func.func @_linear_vpu_kernel(%arg0: memref<8x2xf32, #tpu.memory_space<vmem>>, %arg1: memref<2x2xf32, #tpu.memory_space<vmem>>, %arg2: memref<1x2xf32, #tpu.memory_space<vmem>>, %arg3: memref<8x2xf32, #tpu.memory_space<vmem>>) attributes {dimension_semantics = [], scalar_prefetch = 0 : i64, scratch_operands = 0 : i64, tpu.core_type = #tpu.core_type<tc>} {
    %c0 = arith.constant 0 : index
    %c0_0 = arith.constant 0 : index
    %0 = vector.load %arg0[%c0, %c0_0] : memref<8x2xf32, #tpu.memory_space<vmem>>, vector<8x2xf32>
    %c0_1 = arith.constant 0 : index
    %c0_2 = arith.constant 0 : index
    %1 = vector.load %arg1[%c0_1, %c0_2] : memref<2x2xf32, #tpu.memory_space<vmem>>, vector<2x2xf32>
    %c0_3 = arith.constant 0 : index
    %c0_4 = arith.constant 0 : index
    %2 = vector.load %arg2[%c0_3, %c0_4] : memref<1x2xf32, #tpu.memory_space<vmem>>, vector<1x2xf32>
    %3 = vector.extract_strided_slice %0 {offsets = [0, 0], sizes = [8, 1], strides = [1, 1]} : vector<8x2xf32> to vector<8x1xf32>
    %4 = vector.extract_strided_slice %1 {offsets = [0, 0], sizes = [1, 2], strides = [1, 1]} : vector<2x2xf32> to vector<1x2xf32>
    %5 = vector.broadcast %3 : vector<8x1xf32> to vector<8x2xf32>
    %6 = vector.broadcast %4 : vector<1x2xf32> to vector<8x2xf32>
    %7 = arith.mulf %5, %6 : vector<8x2xf32>
    %8 = vector.broadcast %2 : vector<1x2xf32> to vector<8x2xf32>
    %9 = arith.addf %8, %7 : vector<8x2xf32>
    %10 = vector.extract_strided_slice %0 {offsets = [0, 1], sizes = [8, 1], strides = [1, 1]} : vector<8x2xf32> to vector<8x1xf32>
    %11 = vector.extract_strided_slice %1 {offsets = [1, 0], sizes = [1, 2], strides = [1, 1]} : vector<2x2xf32> to vector<1x2xf32>
    %12 = vector.broadcast %10 : vector<8x1xf32> to vector<8x2xf32>
    %13 = vector.broadcast %11 : vector<1x2xf32> to vector<8x2xf32>
    %14 = arith.mulf %12, %13 : vector<8x2xf32>
    %15 = arith.addf %9, %14 : vector<8x2xf32>
    %c0_5 = arith.constant 0 : index
    %c0_6 = arith.constant 0 : index
    %16 = vector.load %arg3[%c0_5, %c0_6] : memref<8x2xf32, #tpu.memory_space<vmem>>, vector<8x2xf32>
    tpu.vector_store %arg3[%c0_5, %c0_6], %15 {strides = array<i32>} : memref<8x2xf32, #tpu.memory_space<vmem>>, vector<8x2xf32>,
    return
  }
}

</mosaic_0001>

<bundles_post_ra>
// kernel: tpu_custom_call.1
= control target key start
LH: loop header
LB: loop body
LE: loop exit
PB: predicated region body
PF: predicated region fallthrough
CT: control target
= control target key end

     0   :  { %v55_v0 = vmov 0   ;;  %v56_v2 = vmov 1   ;;  %v22_v3 = vlaneseq  ;;  %vm44_vm0 = vcmask 15360   ;;  %s89_s0 = inlined_call_operand.vmem [shape: f32[8,2], index: 0, kind: input, shape index: {}]   ;;  %s90_s1 = inlined_call_operand.vmem [shape: f32[2,2], index: 1, kind: input, shape index: {}]   ;;  %s91_s2 = inlined_call_operand.vmem [shape: f32[1,2], index: 2, kind: input, shape index: {}]   ;;  %s92_s3 = inlined_call_operand.vmem [shape: f32[8,2], index: 3, kind: output, shape index: {}]  }
   0x1   :  { %53 = vset.pattern.permute.xlu0 %v55_v0  ;;  %v14_v1 = vld [vmem:[%s89_s0] sm:$0xff] }
   0x2   :  { %19 = vperm.xlu0 %53, %v14_v1   ;;  %v23_v4 = vshrl.u32 %v22_v3, 7  ;;  %v15_v6 = vld [vmem:[%s90_s1] sm:$0x3] }
   0x3   :  { %v50_v12 = vld [vmem:[%s91_s2] ss:$0 sm:$0xff] }
   0x4   :  { %v24_v5 = vsub.s32 0, %v23_v4  ;;  %v40_v8 = vsub.s32 1, %v23_v4 }
   0x6   :  { %54 = vset.pattern.permute.xlu0 %v56_v2  ;;  %v25_v7 = vrot.slane %v15_v6, %v24_v5  ;;  %v41_v11 = vrot.slane %v15_v6, %v40_v8 }
   0x7   :  { %35 = vperm.xlu0 %54, %v14_v1  }
  0x81   :  { %v20_v9 = vpop.permute.xlu0 %19 }
  0x82   :  { %v26_v10 = vmul.f32 %v25_v7, %v20_v9 }
  0x84   :  { %v33_v14 = vadd.f32 %v50_v12, %v26_v10 }
  0x86   :  { %v36_v13 = vpop.permute.xlu0 %35 }
  0x87   :  { %v42_v15 = vmul.f32 %v41_v11, %v36_v13 }
  0x89   :  { %v43_v16 = vadd.f32 %v42_v15, %v33_v14 }
  0x8b   :  { %45 = vst.msk [vmem:[%s92_s3] sm:$0xff] %vm44_vm0, %v43_v16 }

</bundles_post_ra>
